<compile_context>
chip_gen: v5e
topology: v5e:2x2
jax: 0.10.0
libtpu: 0.0.40
codegen_flags: <defaults>
</compile_context>

<pallas_src>
import jax
import jax.numpy as jnp
from jax.experimental import pallas as pl
from jax.experimental.pallas import tpu as pltpu

_LANES = 128


def _tanh_kernel(x_ref, o_ref):
    # (tanh(x) + 1) / 2  ==  tanh(x) * 0.5 + 0.5
    o_ref[...] = jnp.tanh(x_ref[...]) * 0.5 + 0.5


def _sublane_multiple(dtype) -> int:
    # Sub-32-bit dtypes pack along sublanes: native tile is (8*32/bits, 128).
    itemsize = jnp.dtype(dtype).itemsize
    return {4: 8, 2: 16, 1: 32}.get(itemsize, 8)


def _device_tuning():
    """Returns (target_block_bytes, vmem_limit_bytes_or_None, has_two_cores)."""
    try:
        kind = jax.devices()[0].device_kind.lower()
    except Exception:
        kind = ""
    is_v7 = ("v7" in kind) or ("7x" in kind)
    if is_v7:
        # 8 MiB blocks x 2 buffers x (in + out) = 32 MiB of double-buffers,
        # plus headroom, inside v7x's 64 MiB physical VMEM.
        return 8 << 20, 48 << 20, True
    # v5e / v6e: 2 MiB blocks sit at the ~85-86% HBM-roofline plateau and
    # 2 MiB x 2 bufs x (in+out) = 8 MiB fits the default scoped-VMEM limits,
    # so no vmem override is needed.
    return 2 << 20, None, False


def tanh_half(x: jax.Array) -> jax.Array:
    """Computes (tanh(x) + 1) / 2 with a Pallas TPU kernel.

    Works for any shape / float dtype.  The lane-aligned part of the tensor
    streams through a 1-D grid of large row tiles over a (rows, 128) slab
    (ragged final block handled by Pallas); a sub-128-element tail, if any,
    is computed with plain XLA ops.
    """
    orig_shape = x.shape
    dtype = x.dtype
    n = x.size
    if n == 0:
        return x

    x_flat = x.reshape(-1)
    n_main = (n // _LANES) * _LANES

    if n_main == 0:
        # Tiny input (< one vreg row): not worth launching a kernel.
        return (jnp.tanh(x) * 0.5 + 0.5).astype(dtype)

    itemsize = jnp.dtype(dtype).itemsize
    sub = _sublane_multiple(dtype)
    rows = n_main // _LANES
    x2d = x_flat[:n_main].reshape(rows, _LANES)

    block_bytes, vmem_limit, two_cores = _device_tuning()

    # Row tile: multi-MiB target, multiple of the sublane count, never larger
    # than the (sublane-rounded) row count so tiny inputs don't waste VMEM.
    tr_target = max(sub, (block_bytes // (_LANES * itemsize)) // sub * sub)
    tr = min(tr_target, pl.cdiv(rows, sub) * sub)
    if two_cores and rows >= 2 * sub:
        # Keep >= 2 grid steps so both v7x TensorCores are fed under the
        # "parallel" dimension semantics.
        half = max(sub, (rows // 2) // sub * sub)
        tr = min(tr, half)

    grid = (pl.cdiv(rows, tr),)

    out2d = pl.pallas_call(
        _tanh_kernel,
        out_shape=jax.ShapeDtypeStruct((rows, _LANES), dtype),
        grid_spec=pltpu.PrefetchScalarGridSpec(
            num_scalar_prefetch=0,
            grid=grid,
            in_specs=[pl.BlockSpec((tr, _LANES), lambda i: (i, 0))],
            out_specs=pl.BlockSpec((tr, _LANES), lambda i: (i, 0)),
        ),
        compiler_params=pltpu.CompilerParams(
            dimension_semantics=("parallel",),
            vmem_limit_bytes=vmem_limit,
        ),
    )(x2d)

    out_main = out2d.reshape(-1)
    if n_main == n:
        return out_main.reshape(orig_shape)

    # Sub-128-element tail: plain XLA on the tiny view (no whole-tensor pad).
    tail = x_flat[n_main:]
    out_tail = (jnp.tanh(tail) * 0.5 + 0.5).astype(dtype)
    return jnp.concatenate([out_main, out_tail]).reshape(orig_shape)


if __name__ == "__main__":
    key = jax.random.PRNGKey(0)
    x = jax.random.normal(key, (2, 4, 16, 16), dtype=jnp.float32)

    out = tanh_half(x)
    out = jax.block_until_ready(out)

    # Correctness check against plain JAX reference.
    ref = (jnp.tanh(x) + 1.0) / 2.0
    assert out.shape == x.shape and out.dtype == x.dtype
    assert jnp.allclose(out, ref, atol=1e-6, rtol=1e-6)

    print("KERNEL_OK")
</pallas_src>

<mosaic_0001>
module attributes {stable_mosaic.version = 11 : i64} {
  func.func @_tanh_kernel(%arg0: i32, %arg1: memref<16x128xf32, #tpu.memory_space<vmem>>, %arg2: memref<16x128xf32, #tpu.memory_space<vmem>>) attributes {dimension_semantics = [#tpu.dimension_semantics<parallel>], iteration_bounds = array<i64: 1>, scalar_prefetch = 0 : i64, scratch_operands = 0 : i64, tpu.core_type = #tpu.core_type<tc>, window_params = [{transform_indices = @transform_0, window_bounds = array<i64: 16, 128>}, {transform_indices = @transform_1, window_bounds = array<i64: 16, 128>}]} {
    %c0 = arith.constant 0 : index
    %c0_0 = arith.constant 0 : index
    %0 = vector.load %arg1[%c0, %c0_0] : memref<16x128xf32, #tpu.memory_space<vmem>>, vector<16x128xf32>
    %1 = math.tanh %0 : vector<16x128xf32>
    %cst = arith.constant 5.000000e-01 : f32
    %2 = vector.broadcast %cst : f32 to vector<16x128xf32>
    %3 = arith.mulf %1, %2 : vector<16x128xf32>
    %cst_1 = arith.constant 5.000000e-01 : f32
    %4 = vector.broadcast %cst_1 : f32 to vector<16x128xf32>
    %5 = arith.addf %3, %4 : vector<16x128xf32>
    %c0_2 = arith.constant 0 : index
    %c0_3 = arith.constant 0 : index
    %6 = vector.load %arg2[%c0_2, %c0_3] : memref<16x128xf32, #tpu.memory_space<vmem>>, vector<16x128xf32>
    tpu.vector_store %arg2[%c0_2, %c0_3], %5 {strides = array<i32>} : memref<16x128xf32, #tpu.memory_space<vmem>>, vector<16x128xf32>,
    return
  }
  func.func @transform_0(%arg0: i32) -> (i32, i32) {
    %c0_i32 = arith.constant 0 : i32
    %c0_i32_0 = arith.constant 0 : i32
    return %arg0, %c0_i32 : i32, i32
  }
  func.func @transform_1(%arg0: i32) -> (i32, i32) {
    %c0_i32 = arith.constant 0 : i32
    %c0_i32_0 = arith.constant 0 : i32
    return %arg0, %c0_i32 : i32, i32
  }
}

</mosaic_0001>

<bundles_post_ra>
// kernel: tpu_custom_call.1
= control target key start
LH: loop header
LB: loop body
LE: loop exit
PB: predicated region body
PF: predicated region fallthrough
CT: control target
= control target key end

     0   :  { %6 = vsyncpa [#allocation3], 0  ;;  %s134_s0 = inlined_call_operand.hbm [shape: f32[16,128], index: 0, kind: input, shape index: {}]   ;;  %s135_s1 = inlined_call_operand.hbm [shape: f32[16,128], index: 1, kind: output, shape index: {}]  }
   0x1   :  { %7 = vsyncpa [#allocation4], 0  ;;  %s12_s8 = sshll.u32 %s134_s0, 4  ;;  %s114_s9 = smov [#allocation2]   ;;  %s13_s8 = int_to_ptr.hbm [resolvable:$true] %s12_s8 }
   0x2   :  { %s14_s10 = sshll.u32 %s114_s9, 4  ;;  %s115_s11 = smov 128   ;;  %s15_s10 = int_to_ptr.vmem [resolvable:$true] %s14_s10 }
   0x3   :  { %s116_s12 = smov 8  }
   0x4   :  { %20 = dma.hbm_to_vmem [thread:$0]  %s13_s8, 256, %s15_s10, [#allocation3], %s115_s11, %s115_s11, %s116_s12  }
   0x5   :  { %110 = dma.done.wait [#allocation3], 256  }
   0x6   :  { %111 = vsyncadd [#allocation3], 4294967040  ;;  %v25_v0 = vld [vmem:[#allocation2] sm:$0xff]  ;;  %v26_v1 = vld [vmem:[#allocation2 + $0x8] sm:$0xff]  ;;  %s117_s13 = smov [#allocation5]   ;;  %s41_s16 = sshll.u32 %s135_s1, 4  ;;  %s42_s16 = int_to_ptr.hbm [resolvable:$true] %s41_s16 }
   0x7   :  { %58 = vtanh.f32 %v25_v0  ;;  %s39_s14 = sshll.u32 %s117_s13, 4  ;;  %s40_s14 = int_to_ptr.vmem [resolvable:$true] %s39_s14 }
   0x8   :  { %60 = vtanh.f32 %v26_v1 }
   0xd   :  { %v59_v2 = vpop.eup %58 }
   0xe   :  { %v61_v3 = vpop.eup %60  ;;  %v29_v4 = vmul.f32 0.5, %v59_v2 }
   0xf   :  { %v30_v5 = vmul.f32 0.5, %v61_v3 }
  0x10   :  { %v31_v6 = vadd.f32 0.5, %v29_v4 }
  0x11   :  { %v32_v7 = vadd.f32 0.5, %v30_v5 }
  0x12   :  { %33 = vst [vmem:[#allocation5] sm:$0xff] %v31_v6 }
  0x13   :  { %34 = vst [vmem:[#allocation5 + $0x8] sm:$0xff] %v32_v7 }
  0x14   :  { %47 = dma.vmem_to_hbm [thread:$0]  %s40_s14, 256, %s42_s16, [#allocation4], %s115_s11, %s115_s11, %s116_s12  }
  0x15   :  { %112 = dma.done.wait [#allocation4], 256  }
  0x16   :  { %113 = vsyncadd [#allocation4], 4294967040 }
  0x17   :  { %52 = vsyncpa [#allocation3], 1 }
  0x18   :  { %53 = vsyncpa [#allocation4], 1 }

</bundles_post_ra>
